<compile_context>
chip_gen: v7x
topology: tpu7x:2x2x1
jax: 0.10.0
libtpu: 0.0.40
codegen_flags: <defaults>
</compile_context>

<pallas_src>
import jax
import jax.numpy as jnp
from jax import lax
from jax.experimental import pallas as pl
from jax.experimental.pallas import tpu as pltpu


def _round_up(x: int, m: int) -> int:
    return (x + m - 1) // m * m


def _linear_kernel(x_ref, w_ref, b_ref, o_ref):
    # x_ref: (TM, H_IN_pad)   w_ref: (H_OUT_pad, H_IN_pad)   b_ref: (1, H_OUT_pad)
    # Contract x's last axis with w's last axis (MXU matmul with transposed RHS),
    # accumulate in f32 regardless of input dtype.
    acc = lax.dot_general(
        x_ref[...], w_ref[...],
        dimension_numbers=(((1,), (1,)), ((), ())),
        preferred_element_type=jnp.float32)
    o_ref[...] = (acc + b_ref[...]).astype(o_ref.dtype)


def time_distributed_linear(x, weight, bias, *, tm: int = 512):
    """Equivalent of TimeDistributed(nn.Linear(H_IN, H_OUT))(x).

    x:      (B, T, H_IN)
    weight: (H_OUT, H_IN)   (PyTorch nn.Linear convention; NOT transposed here)
    bias:   (H_OUT,)
    returns (B, T, H_OUT)
    """
    B, T, H_IN = x.shape
    H_OUT = weight.shape[0]
    BT = B * T

    # ---- TimeDistributed._reshape_tensor: squash (B, T, rest) -> (B*T, rest) --
    x_flat = x.reshape(BT, H_IN)

    # ---- Pad to hardware-friendly sizes (lane-dense 128-multiple features,
    #      sublane-aligned rows).  Zero padding is exact for matmul+bias and is
    #      sliced off below. ------------------------------------------------
    h_in_p = _round_up(H_IN, 128)
    h_out_p = _round_up(H_OUT, 128)
    tm_eff = min(tm, _round_up(BT, 8))      # row tile: multiple of 8 (f32 sublane)
    bt_p = _round_up(BT, tm_eff)

    x_p = jnp.pad(x_flat, ((0, bt_p - BT), (0, h_in_p - H_IN)))
    w_p = jnp.pad(weight, ((0, h_out_p - H_OUT), (0, h_in_p - H_IN)))
    b_p = jnp.pad(bias, (0, h_out_p - H_OUT)).reshape(1, h_out_p)

    grid_m = bt_p // tm_eff

    cost = pl.CostEstimate(
        flops=2 * bt_p * h_in_p * h_out_p,
        transcendentals=0,
        bytes_accessed=x_p.dtype.itemsize * (bt_p * h_in_p + h_in_p * h_out_p)
        + x_p.dtype.itemsize * bt_p * h_out_p,
    )

    # NOTE: for very large H_IN (>= ~2K) add a trailing K grid axis with an
    # f32 VMEM accumulator (zero @ k==0, bias+cast @ k==last) to keep the
    # resident weight slice within v7x's 64 MiB VMEM; not needed at these sizes.
    out_p = pl.pallas_call(
        _linear_kernel,
        out_shape=jax.ShapeDtypeStruct((bt_p, h_out_p), x.dtype),
        grid_spec=pltpu.PrefetchScalarGridSpec(
            num_scalar_prefetch=0,
            grid=(grid_m,),
            in_specs=[
                pl.BlockSpec((tm_eff, h_in_p), lambda i: (i, 0)),      # x: tiled over rows
                pl.BlockSpec((h_out_p, h_in_p), lambda i: (0, 0)),     # weight: resident
                pl.BlockSpec((1, h_out_p), lambda i: (0, 0)),          # bias:   resident
            ],
            out_specs=pl.BlockSpec((tm_eff, h_out_p), lambda i: (i, 0)),
        ),
        compiler_params=pltpu.CompilerParams(
            dimension_semantics=("parallel",)),   # rows are independent -> megacore
        cost_estimate=cost,
    )(x_p, w_p, b_p)

    # ---- Strip padding and restore TimeDistributed output shape --------------
    return out_p[:BT, :H_OUT].reshape(B, T, H_OUT)


if __name__ == "__main__":
    B, T, H_IN, H_OUT = 2, 8, 32, 64

    key = jax.random.PRNGKey(0)
    kx, kw, kb = jax.random.split(key, 3)

    x = jax.random.normal(kx, (B, T, H_IN), dtype=jnp.float32)
    # nn.Linear-style synthetic parameters: weight (H_OUT, H_IN), bias (H_OUT,)
    bound = 1.0 / (H_IN ** 0.5)
    weight = jax.random.uniform(kw, (H_OUT, H_IN), jnp.float32, -bound, bound)
    bias = jax.random.uniform(kb, (H_OUT,), jnp.float32, -bound, bound)

    out = time_distributed_linear(x, weight, bias)
    out = jax.block_until_ready(out)

    # Reference (same TimeDistributed semantics, plain JAX).
    ref = (x.reshape(B * T, H_IN) @ weight.T + bias).reshape(B, T, H_OUT)
    assert out.shape == (B, T, H_OUT)
    assert jnp.allclose(out, ref, atol=1e-5, rtol=1e-5)

    print("KERNEL_OK")
</pallas_src>

<mosaic_0001>
module attributes {stable_mosaic.version = 11 : i64} {
  func.func @_linear_kernel(%arg0: i32, %arg1: memref<16x128xf32, #tpu.memory_space<vmem>>, %arg2: memref<128x128xf32, #tpu.memory_space<vmem>>, %arg3: memref<1x128xf32, #tpu.memory_space<vmem>>, %arg4: memref<16x128xf32, #tpu.memory_space<vmem>>) attributes {dimension_semantics = [#tpu.dimension_semantics<parallel>], iteration_bounds = array<i64: 1>, scalar_prefetch = 0 : i64, scratch_operands = 0 : i64, tpu.core_type = #tpu.core_type<tc>, window_params = [{transform_indices = @transform_0, window_bounds = array<i64: 16, 128>}, {pipeline_mode = #tpu.pipeline_mode<synchronous>, transform_indices = @transform_1, window_bounds = array<i64: 128, 128>}, {pipeline_mode = #tpu.pipeline_mode<synchronous>, transform_indices = @transform_2, window_bounds = array<i64: 1, 128>}, {transform_indices = @transform_3, window_bounds = array<i64: 16, 128>}]} {
    %c0 = arith.constant 0 : index
    %c0_0 = arith.constant 0 : index
    %0 = vector.load %arg1[%c0, %c0_0] : memref<16x128xf32, #tpu.memory_space<vmem>>, vector<16x128xf32>
    %c0_1 = arith.constant 0 : index
    %c0_2 = arith.constant 0 : index
    %1 = vector.load %arg2[%c0_1, %c0_2] : memref<128x128xf32, #tpu.memory_space<vmem>>, vector<128x128xf32>
    %cst = arith.constant dense<0.000000e+00> : vector<16x128xf32>
    %2 = tpu.matmul %0, %1, %cst {dimension_numbers = #tpu.dot_dimension_numbers<[1], [1], [0], [0], [0, 0, 1, 0], [], []>} : vector<16x128xf32>, vector<128x128xf32>, vector<16x128xf32> -> vector<16x128xf32>
    %c0_3 = arith.constant 0 : index
    %c0_4 = arith.constant 0 : index
    %3 = vector.load %arg3[%c0_3, %c0_4] : memref<1x128xf32, #tpu.memory_space<vmem>>, vector<1x128xf32>
    %4 = vector.broadcast %3 : vector<1x128xf32> to vector<16x128xf32>
    %5 = arith.addf %2, %4 : vector<16x128xf32>
    %c0_5 = arith.constant 0 : index
    %c0_6 = arith.constant 0 : index
    %6 = vector.load %arg4[%c0_5, %c0_6] : memref<16x128xf32, #tpu.memory_space<vmem>>, vector<16x128xf32>
    tpu.vector_store %arg4[%c0_5, %c0_6], %5 {strides = array<i32>} : memref<16x128xf32, #tpu.memory_space<vmem>>, vector<16x128xf32>,
    return
  }
  func.func @transform_0(%arg0: i32) -> (i32, i32) {
    %c0_i32 = arith.constant 0 : i32
    %c0_i32_0 = arith.constant 0 : i32
    return %arg0, %c0_i32 : i32, i32
  }
  func.func @transform_1(%arg0: i32) -> (i32, i32) {
    %c0_i32 = arith.constant 0 : i32
    %c0_i32_0 = arith.constant 0 : i32
    %c0_i32_1 = arith.constant 0 : i32
    return %c0_i32, %c0_i32_0 : i32, i32
  }
  func.func @transform_2(%arg0: i32) -> (i32, i32) {
    %c0_i32 = arith.constant 0 : i32
    %c0_i32_0 = arith.constant 0 : i32
    %c0_i32_1 = arith.constant 0 : i32
    return %c0_i32, %c0_i32_0 : i32, i32
  }
  func.func @transform_3(%arg0: i32) -> (i32, i32) {
    %c0_i32 = arith.constant 0 : i32
    %c0_i32_0 = arith.constant 0 : i32
    return %arg0, %c0_i32 : i32, i32
  }
}

</mosaic_0001>

<bundles_post_ra>
// kernel: tpu_custom_call.1
= control target key start
LH: loop header
LB: loop body
LE: loop exit
PB: predicated region body
PF: predicated region fallthrough
CT: control target
= control target key end

     0   :  { %8 = vsyncpa [#allocation3], 0  ;;  %s399_s0 = inlined_call_operand.hbm [shape: f32[16,128], index: 0, kind: input, shape index: {}]   ;;  %s400_s1 = inlined_call_operand.hbm [shape: f32[128,128], index: 1, kind: input, shape index: {}]   ;;  %s401_s2 = inlined_call_operand.vmem [shape: f32[1,128], index: 2, kind: input, shape index: {}]   ;;  %s402_s3 = inlined_call_operand.hbm [shape: f32[16,128], index: 3, kind: output, shape index: {}]  }
   0x1   :  { %9 = vsyncpa [#allocation6], 0 }
   0x2   :  { %10 = vsyncpa [#allocation4], 0  ;;  %s326_s12 = smov [#allocation2]   ;;  %s254_s16 = scalar_lea.hbm %s399_s0, 256 }
   0x3   :  { %s16_s13 = sshll.u32 %s326_s12, 4  ;;  %p255_p0 = scmp.ne.s32.totalorder %s399_s0, %s254_s16  ;;  %s17_s13 = int_to_ptr.vmem [resolvable:$true] %s16_s13 }
   0x4   :  { %p258_p1 = scmp.lt.u32.totalorder %s254_s16, %s399_s0 }
   0x6   :  { %p260_p2 = pnand %p258_p1, %p255_p0 }
   0x8   :  { %263 = shalt.err (!%p260_p2)
}
   0x9   :  { %s264_s21 = scalar_lea.vmem %s17_s13, 256  ;;  %p269_p4 = scmp.lt.s32.totalorder %s17_s13, %s17_s13 }
   0xa   :  { %p265_p3 = scmp.ne.s32.totalorder %s17_s13, %s264_s21  ;;  %p270_p5 = scmp.lt.s32.totalorder %s264_s21, %s264_s21 }
   0xc   :  { %p271_p6 = por %p270_p5, %p269_p4 }
   0xe   :  { %p272_p7 = pnand %p271_p6, %p265_p3 }
  0x10   :  { %275 = shalt.err (!%p272_p7)
}
  0x11   :  { %s327_s22 = smov 128   ;;  %s328_s23 = smov 8  }
  0x12   :  { %22 = dma.hbm_to_vmem [thread:$0]  %s399_s0, 256, %s17_s13, [#allocation3], %s327_s22, %s327_s22, %s328_s23  }
  0x13   :  { %s329_s26 = smov [#allocation5]   ;;  %s276_s30 = scalar_lea.hbm %s400_s1, 2048 }
  0x14   :  { %s28_s27 = sshll.u32 %s329_s26, 4  ;;  %p277_p8 = scmp.ne.s32.totalorder %s400_s1, %s276_s30  ;;  %s29_s27 = int_to_ptr.vmem [resolvable:$true] %s28_s27 }
  0x15   :  { %p280_p9 = scmp.lt.u32.totalorder %s276_s30, %s400_s1 }
  0x17   :  { %p282_p10 = pnand %p280_p9, %p277_p8 }
  0x19   :  { %285 = shalt.err (!%p282_p10)
}
  0x1a   :  { %s286_s8 = scalar_lea.vmem %s29_s27, 2048  ;;  %p291_p12 = scmp.lt.s32.totalorder %s29_s27, %s29_s27 }
  0x1b   :  { %p287_p11 = scmp.ne.s32.totalorder %s29_s27, %s286_s8  ;;  %p292_p13 = scmp.lt.s32.totalorder %s286_s8, %s286_s8 }
  0x1d   :  { %p293_p0 = por %p292_p13, %p291_p12 }
  0x1f   :  { %p294_p1 = pnand %p293_p0, %p287_p11 }
  0x21   :  { %297 = shalt.err (!%p294_p1)
}
  0x22   :  { %34 = dma.hbm_to_vmem [thread:$0]  %s400_s1, 2048, %s29_s27, [#allocation6], %s327_s22, %s327_s22, %s328_s23  }
  0x23   :  { %320 = dma.done.wait [#allocation3], 256  }
  0x24   :  { %321 = vsyncadd [#allocation3], 4294967040 }
  0x25   :  { %322 = dma.done.wait [#allocation6], 2048  }
  0x26   :  { %323 = vsyncadd [#allocation6], 4294965248  ;;  %v45_v0 = vld [vmem:[#allocation5] sm:$0xff]  ;;  %v46_v1 = vld [vmem:[#allocation5 + $0x8] sm:$0xff]  ;;  %s330_s11 = smov [#allocation7]  }
  0x27   :  { %v47_v2 = vld [vmem:[#allocation5 + $0x10] sm:$0xff]  ;;  %v217_v3 = vpack.c.bf16 %v46_v1, %v45_v0  ;;  %v48_v4 = vld [vmem:[#allocation5 + $0x18] sm:$0xff]  ;;  %v49_v7 = vld [vmem:[#allocation5 + $0x20] sm:$0xff]  ;;  %s150_s12 = sshll.u32 %s330_s11, 4  ;;  %s151_s12 = int_to_ptr.vmem [resolvable:$true] %s150_s12 }
  0x28   :  { %v221_v5 = vpack.c.bf16 %v48_v4, %v47_v2  ;;  %v43_v6 = vld [vmem:[#allocation2] sm:$0xff]  ;;  %v50_v8 = vld [vmem:[#allocation5 + $0x28] sm:$0xff]  ;;  %v52_v11 = vld [vmem:[#allocation5 + $0x38] sm:$0xff]  ;;  %s298_s13 = scalar_lea.vmem %s151_s12, 256  ;;  %p303_p3 = scmp.lt.s32.totalorder %s151_s12, %s151_s12 }
  0x29   :  { %218 = vmatprep.subr.bf16.mxu0 %v217_v3  ;;  %214 = vmatprep.mubr.f32.mxu0 %v43_v6  ;;  %v225_v9 = vpack.c.bf16 %v50_v8, %v49_v7  ;;  %v51_v10 = vld [vmem:[#allocation5 + $0x30] sm:$0xff]  ;;  %v53_v13 = vld [vmem:[#allocation5 + $0x40] sm:$0xff]  ;;  %v54_v14 = vld [vmem:[#allocation5 + $0x48] sm:$0xff]  ;;  %p299_p2 = scmp.ne.s32.totalorder %s151_s12, %s298_s13  ;;  %p304_p4 = scmp.lt.s32.totalorder %s298_s13, %s298_s13 }
  0x2a   :  { %220 = vmatpush3.bf16.xpose.msra.mxu0 %v217_v3  ;;  %v229_v12 = vpack.c.bf16 %v52_v11, %v51_v10  ;;  %v233_v15 = vpack.c.bf16 %v54_v14, %v53_v13  ;;  %v55_v16 = vld [vmem:[#allocation5 + $0x50] sm:$0xff]  ;;  %v56_v17 = vld [vmem:[#allocation5 + $0x58] sm:$0xff]  ;;  %v57_v19 = vld [vmem:[#allocation5 + $0x60] sm:$0xff] }
  0x2b   :  { %222 = vmatprep.subr.bf16.mxu0 %v221_v5  ;;  %v237_v18 = vpack.c.bf16 %v56_v17, %v55_v16  ;;  %v58_v20 = vld [vmem:[#allocation5 + $0x68] sm:$0xff]  ;;  %v59_v22 = vld [vmem:[#allocation5 + $0x70] sm:$0xff]  ;;  %v60_v23 = vld [vmem:[#allocation5 + $0x78] sm:$0xff]  ;;  %p305_p5 = por %p304_p4, %p303_p3 }
  0x2c   :  { %v241_v21 = vpack.c.bf16 %v58_v20, %v57_v19  ;;  %v245_v24 = vpack.c.bf16 %v60_v23, %v59_v22  ;;  %v44_v25 = vld [vmem:[#allocation2 + $0x8] sm:$0xff]  ;;  %v163_v26 = vld [vmem:[%s401_s2] ss:$0 sm:$0xff] }
  0x2d   :  { %p306_p6 = pnand %p305_p5, %p299_p2 }
  0x32   :  { %224 = vmatpush3.bf16.xpose.msra.mxu0 %v221_v5 }
  0x33   :  { %226 = vmatprep.subr.bf16.mxu0 %v225_v9 }
  0x3a   :  { %228 = vmatpush3.bf16.xpose.msra.mxu0 %v225_v9 }
  0x3b   :  { %230 = vmatprep.subr.bf16.mxu0 %v229_v12 }
  0x42   :  { %232 = vmatpush3.bf16.xpose.msra.mxu0 %v229_v12 }
  0x43   :  { %234 = vmatprep.subr.bf16.mxu0 %v233_v15 }
  0x4a   :  { %236 = vmatpush3.bf16.xpose.msra.mxu0 %v233_v15 }
  0x4b   :  { %238 = vmatprep.subr.bf16.mxu0 %v237_v18 }
  0x52   :  { %240 = vmatpush3.bf16.xpose.msra.mxu0 %v237_v18 }
  0x53   :  { %242 = vmatprep.subr.bf16.mxu0 %v241_v21 }
  0x5a   :  { %244 = vmatpush3.bf16.xpose.msra.mxu0 %v241_v21 }
  0x5b   :  { %246 = vmatprep.subr.bf16.mxu0 %v245_v24 }
  0x62   :  { %248 = vmatpush3.bf16.xpose.msra.mxu0 %v245_v24 }
  0x69   :  { %215 = vmatmul.mubr.f32.vlgmr.msra.gmra.mrb[0].mxu0 %v44_v25 }
 0x13c   :  { %v216_v27 = vpop.f32.mrb[0].mxu0 }
 0x13d   :  { %v140_v28 = vadd.f32 %v216_v27, %v163_v26  ;;  %v134_v29 = vpop.f32.mrb[1].mxu0 }
 0x13e   :  { %v135_v30 = vadd.f32 %v163_v26, %v134_v29 }
 0x13f   :  { %144 = vst [vmem:[#allocation7 + $0x8] sm:$0xff] %v140_v28 }
 0x140   :  { %143 = vst [vmem:[#allocation7] sm:$0xff] %v135_v30 }
 0x141   :  { %309 = shalt.err (!%p306_p6)
}
 0x142   :  { %s310_s2 = scalar_lea.hbm %s402_s3, 256 }
 0x143   :  { %p311_p7 = scmp.ne.s32.totalorder %s402_s3, %s310_s2  ;;  %p314_p8 = scmp.lt.u32.totalorder %s310_s2, %s402_s3 }
 0x145   :  { %p316_p9 = pnand %p314_p8, %p311_p7 }
 0x147   :  { %319 = shalt.err (!%p316_p9)
}
 0x148   :  { %156 = dma.vmem_to_hbm [thread:$0]  %s151_s12, 256, %s402_s3, [#allocation4], %s327_s22, %s327_s22, %s328_s23  }
 0x149   :  { %324 = dma.done.wait [#allocation4], 256  }
 0x14a   :  { %325 = vsyncadd [#allocation4], 4294967040 }
 0x14b   :  { %160 = vsyncpa [#allocation3], 1 }
 0x14c   :  { %161 = vsyncpa [#allocation6], 1 }
 0x14d   :  { %162 = vsyncpa [#allocation4], 1 }

</bundles_post_ra>
